<compile_context>
chip_gen: v7x
topology: tpu7x:2x2x1
jax: 0.10.0
libtpu: 0.0.40
codegen_flags: <defaults>
</compile_context>

<pallas_src>
import math
from functools import partial

import numpy as np
from numpy.polynomial import polynomial as npoly

import jax
import jax.numpy as jnp
from jax.experimental import pallas as pl
from jax.experimental.pallas import tpu as pltpu


# ----------------------------------------------------------------------------
# Parameter / filter construction (plain numpy; mirrors attorch's hermite code)
# ----------------------------------------------------------------------------
def _fact(n):
    return float(math.factorial(int(round(n))))


def hermcgen(mu, nu):
    """Ascending-power coefficients of the radial polynomial of a 2D Hermite fn."""
    mu, nu = int(round(mu)), int(round(nu))
    nur = np.arange(nu + 1)
    num = _fact(mu + nu) * _fact(nu) * ((-2.0) ** nur)
    denom = np.array([_fact(mu + r) * _fact(nu - r) * _fact(r) for r in range(nu + 1)])
    return num / denom


def hermite_2d(N, npts, xvalmax=None):
    """2D Hermite function basis: returns (H [nbases, npts, npts], desc, mu)."""
    xvalmax = xvalmax or 2.5 * np.sqrt(N)
    xvalmax = xvalmax * (1.0 - 1.0 / npts)
    xvals = np.linspace(-xvalmax, xvalmax, npts, endpoint=True)[..., None]

    gxv = np.exp(-xvals ** 2 / 4.0)
    gaussian = np.dot(gxv, gxv.T)

    mu = np.array([])
    nu = np.array([])
    desc = []
    for rank in range(N):
        muadd = np.sort(np.abs(np.arange(-rank, rank + 0.1, 2)))
        mu = np.hstack([mu, muadd])
        nu = np.hstack([nu, (rank - muadd) / 2.0])
        if not (rank % 2):
            desc.append('z')
        desc += ['r', 'i'] * int(np.floor((rank + 1) / 2))

    theta = np.arctan2(xvals, xvals.T)
    radsq = xvals ** 2 + xvals.T ** 2
    nbases = mu.size
    H = np.zeros([nbases, npts, npts])
    for i, (mui, nui, di) in enumerate(zip(mu, nu, desc)):
        mui_i, nui_i = int(round(mui)), int(round(nui))
        radvals = npoly.polyval(radsq, hermcgen(mui_i, nui_i))
        basis = gaussian * (radsq ** (mui_i / 2.0)) * radvals * np.exp(1j * mui_i * theta)
        basis = basis / np.sqrt(2.0 ** (mui_i + 2 * nui_i) * np.pi
                                * _fact(mui_i + nui_i) * _fact(nui_i))
        if di == 'z':
            H[i] = basis.real / np.sqrt(2.0)
        elif di == 'r':
            H[i] = basis.real
        else:
            H[i] = basis.imag

    H = H / np.sqrt(np.sum(H ** 2, axis=(1, 2), keepdims=True))
    return H, desc, mu


def rotation_matrix(desc, mu, angle):
    n = len(desc)
    R = np.zeros((n, n))
    i = 0
    while i < n:
        if desc[i] == 'z':
            R[i, i] = 1.0
            i += 1
        else:  # 'r' followed by 'i'
            m = mu[i]
            c, s = np.cos(m * angle), np.sin(m * angle)
            R[i, i], R[i, i + 1] = c, -s
            R[i + 1, i], R[i + 1, i + 1] = s, c
            i += 2
    return R


def rotate_weights_hermite(H, desc, mu, coeffs, num_rotations, first_layer=False):
    """Returns conv weights (out_features*num_rotations, in_features, Kup, Kup),
    output channel ordered as o*num_rotations + r (matches the forward's .view)."""
    n_coeffs, c_in, c_out = coeffs.shape
    kup = H.shape[-1]
    per_rot = []
    for r in range(num_rotations):
        angle = r * 2.0 * np.pi / num_rotations
        R = rotation_matrix(desc, mu, angle)
        c_rot = np.einsum('ij,jkl->ikl', R, coeffs)
        w = np.einsum('ijk,ilm->mljk', H, c_rot)          # (c_out, c_in, Kup, Kup)
        if not first_layer:
            cin_g = c_in // num_rotations
            w = w.reshape(c_out, num_rotations, cin_g, kup, kup)
            w = np.roll(w, shift=r, axis=1)               # cyclic shift of input rotation groups
            w = w.reshape(c_out, c_in, kup, kup)
        per_rot.append(w)
    W = np.stack(per_rot, axis=1)                         # (c_out, R, c_in, Kup, Kup)
    return W.reshape(c_out * num_rotations, c_in, kup, kup)


def avg_pool2d_2x2(w):
    o, i, h, ww = w.shape
    return w.reshape(o, i, h // 2, 2, ww // 2, 2).mean(axis=(3, 5))


# ----------------------------------------------------------------------------
# Pallas kernels
# ----------------------------------------------------------------------------
def _conv_stats_kernel(p_ref, w_ref, y_ref, mom_ref):
    """One deep bf16 MXU matmul per row tile + per-tile BN partial moments.

    p_ref : (TR, Kb_pad)        bf16  row-band patches (lane-dense, zero padded)
    w_ref : (Kb_pad, Wo*Cout)   bf16  banded weight slab (resident, same block)
    y_ref : (TR, Wo*Cout)       f32   conv output, lane-dense
    mom_ref: (1, 8, Wo*Cout)    f32   row0 = column sums, row1 = column sums of squares
    """
    acc = jnp.dot(p_ref[...], w_ref[...], preferred_element_type=jnp.float32)
    y_ref[...] = acc
    lanes = acc.shape[1]
    s1 = jnp.sum(acc, axis=0, keepdims=True)            # (1, L)
    s2 = jnp.sum(acc * acc, axis=0, keepdims=True)      # (1, L)
    pad = jnp.zeros((6, lanes), jnp.float32)
    mom_ref[...] = jnp.concatenate([s1, s2, pad], axis=0).reshape(1, 8, lanes)


def _bn_apply_kernel(y_ref, scale_ref, shift_ref, o_ref):
    """out = y * scale + shift, lane-dense FMA (mean/inv-std/bias pre-fused)."""
    o_ref[...] = y_ref[...] * scale_ref[...] + shift_ref[...]


def _pick_tile_rows(total_rows, target):
    """Largest divisor of total_rows that is <= target and sublane aligned."""
    best = None
    for d in range(1, total_rows + 1):
        if total_rows % d:
            continue
        if d <= target and (d % 8 == 0 or d == total_rows):
            best = d
    return best if best is not None else total_rows


# ----------------------------------------------------------------------------
# Forward wrapper: fused conv2d + BatchNorm3d(training, affine=False) + bias
# ----------------------------------------------------------------------------
@partial(jax.jit,
         static_argnames=("num_rotations", "out_features", "padding", "eps", "tile_rows"))
def rot_equi_conv2d_forward(x_nchw, pooled_weights, bias_of, *,
                            num_rotations, out_features, padding,
                            eps=1e-5, tile_rows=256):
    """Forward of RotEquiConv2d. x: (N, C_in, H, W) NCHW float32.
    pooled_weights: (out_features*num_rotations, C_in, K, K). bias_of: (out_features,)."""
    N, Cin, H, W = x_nchw.shape
    Cout, Cin_w, K, _ = pooled_weights.shape
    assert Cin == Cin_w and Cout == out_features * num_rotations

    Hp, Wp = H + 2 * padding, W + 2 * padding
    Ho, Wo = Hp - K + 1, Wp - K + 1
    L = Wo * Cout                              # lane-dense output width
    rows = N * Ho                              # one matmul row per output image row
    Kb = K * Wp * Cin                          # contraction depth (before padding)
    Kb_pad = ((Kb + 127) // 128) * 128

    TR = _pick_tile_rows(rows, int(tile_rows))
    T = rows // TR

    # --- glue (fuses under jit): NCHW -> NHWC, pad, extract K-row bands -------
    x = jnp.transpose(x_nchw, (0, 2, 3, 1)).astype(jnp.float32)
    x = jnp.pad(x, ((0, 0), (padding, padding), (padding, padding), (0, 0)))
    xrow = x.reshape(N, Hp, Wp * Cin)
    bands = [xrow[:, ky:ky + Ho, :] for ky in range(K)]            # K x (N, Ho, Wp*Cin)
    patches = jnp.concatenate(bands, axis=-1).reshape(rows, Kb)    # (rows, K*Wp*Cin)
    patches = jnp.pad(patches, ((0, 0), (0, Kb_pad - Kb))).astype(jnp.bfloat16)

    # --- banded weight slab: (Kb_pad, Wo*Cout) --------------------------------
    # Wb[ky*Wp*Cin + (w+kx)*Cin + ci, w*Cout + co] = pooled_weights[co, ci, ky, kx]
    w_khwc = jnp.transpose(pooled_weights, (2, 3, 1, 0)).astype(jnp.float32)  # (K,K,Cin,Cout)
    Wb = jnp.zeros((K, Wp, Cin, Wo, Cout), jnp.float32)
    for w in range(Wo):
        Wb = Wb.at[:, w:w + K, :, w, :].set(w_khwc)
    Wb = Wb.reshape(Kb, L)
    Wb = jnp.pad(Wb, ((0, Kb_pad - Kb), (0, 0))).astype(jnp.bfloat16)

    cparams = pltpu.CompilerParams(dimension_semantics=("parallel",),
                                   vmem_limit_bytes=32 * 1024 * 1024)

    # --- pass 1: conv matmul + per-tile BN partial moments --------------------
    y, moments = pl.pallas_call(
        _conv_stats_kernel,
        out_shape=(jax.ShapeDtypeStruct((rows, L), jnp.float32),
                   jax.ShapeDtypeStruct((T, 8, L), jnp.float32)),
        grid=(T,),
        in_specs=[
            pl.BlockSpec((TR, Kb_pad), lambda i: (i, 0)),
            pl.BlockSpec((Kb_pad, L), lambda i: (0, 0)),   # resident, re-used every step
        ],
        out_specs=(
            pl.BlockSpec((TR, L), lambda i: (i, 0)),
            pl.BlockSpec((1, 8, L), lambda i: (i, 0, 0)),
        ),
        compiler_params=cparams,
    )(patches, Wb)

    # --- tiny XLA reduction of the partial moments -> fused scale / shift ----
    # TODO(synk): BatchNorm3d running-mean/var buffer updates (training side
    # effect) are not reproduced; only the forward output (batch stats) is.
    mom = jnp.sum(moments, axis=0)                         # (8, L)
    s1 = mom[0].reshape(Wo, Cout).sum(axis=0)              # (Cout,)
    s2 = mom[1].reshape(Wo, Cout).sum(axis=0)              # (Cout,)
    s1f = s1.reshape(out_features, num_rotations).sum(axis=1)
    s2f = s2.reshape(out_features, num_rotations).sum(axis=1)
    cnt = float(N * Ho * Wo * num_rotations)
    mean_f = s1f / cnt
    # biased variance (PyTorch BN uses biased var for normalization); f32 E[x^2]-E[x]^2
    var_f = s2f / cnt - mean_f * mean_f
    inv_f = 1.0 / jnp.sqrt(var_f + eps)
    bias_f = bias_of.reshape(out_features).astype(jnp.float32)
    scale_c = jnp.repeat(inv_f, num_rotations)                         # (Cout,)
    shift_c = jnp.repeat(bias_f - mean_f * inv_f, num_rotations)       # (Cout,)
    scale_row = jnp.tile(scale_c, Wo).reshape(1, L)                    # lane = w*Cout + c
    shift_row = jnp.tile(shift_c, Wo).reshape(1, L)

    # --- pass 2: normalize + bias (lane-dense FMA) ----------------------------
    out_flat = pl.pallas_call(
        _bn_apply_kernel,
        out_shape=jax.ShapeDtypeStruct((rows, L), jnp.float32),
        grid=(T,),
        in_specs=[
            pl.BlockSpec((TR, L), lambda i: (i, 0)),
            pl.BlockSpec((1, L), lambda i: (0, 0)),
            pl.BlockSpec((1, L), lambda i: (0, 0)),
        ],
        out_specs=pl.BlockSpec((TR, L), lambda i: (i, 0)),
        compiler_params=cparams,
    )(y, scale_row, shift_row)

    # --- glue back to PyTorch NCHW (channel order o*num_rotations + r) -------
    return out_flat.reshape(N, Ho, Wo, Cout).transpose(0, 3, 1, 2)


# ----------------------------------------------------------------------------
# Pure-JAX reference (mirrors the PyTorch forward) for a sanity check
# ----------------------------------------------------------------------------
def reference_forward(x_nchw, pooled_weights, bias_of, num_rotations,
                      out_features, padding, eps=1e-5):
    y = jax.lax.conv_general_dilated(
        x_nchw, pooled_weights, window_strides=(1, 1),
        padding=[(padding, padding), (padding, padding)],
        dimension_numbers=('NCHW', 'OIHW', 'NCHW'))
    N, C, Ho, Wo = y.shape
    y5 = y.reshape(N, out_features, num_rotations, Ho, Wo)
    mean = y5.mean(axis=(0, 2, 3, 4), keepdims=True)
    var = ((y5 - mean) ** 2).mean(axis=(0, 2, 3, 4), keepdims=True)
    y5 = (y5 - mean) / jnp.sqrt(var + eps) + bias_of.reshape(1, out_features, 1, 1, 1)
    return y5.reshape(N, C, Ho, Wo)


if __name__ == "__main__":
    # module config (first_layer=True so in_features is not multiplied by R)
    in_features, out_features, num_rotations = 4, 4, 4
    kernel_size, padding, upsampling, first_layer = 5, 2, 2, True
    N, H, W = 2, 16, 16

    # deterministic parameter init (module __init__ semantics)
    H_basis, desc, mu = hermite_2d(kernel_size, kernel_size * upsampling,
                                   2 * np.sqrt(kernel_size))
    n_coeffs = kernel_size * (kernel_size + 1) // 2
    key = jax.random.PRNGKey(0)
    k_coeffs, k_x = jax.random.split(key)
    coeffs = 0.1 * np.asarray(
        jax.random.normal(k_coeffs, (n_coeffs, in_features, out_features)),
        dtype=np.float64)
    bias = np.zeros((out_features,), dtype=np.float32)  # bias Parameter is zero-init

    W_rot = rotate_weights_hermite(H_basis, desc, mu, coeffs, num_rotations,
                                   first_layer=first_layer)
    W_pooled = avg_pool2d_2x2(W_rot).astype(np.float32)   # (out*R, in, K, K)

    x = jax.random.normal(k_x, (N, in_features, H, W), dtype=jnp.float32)

    # tile_rows=8 -> 4 grid steps on this toy shape, exercising the pipelined
    # grid + split-BN-statistics path (default 256 targets large inputs).
    out = rot_equi_conv2d_forward(x, jnp.asarray(W_pooled), jnp.asarray(bias),
                                  num_rotations=num_rotations,
                                  out_features=out_features,
                                  padding=padding, tile_rows=8)
    out = jax.block_until_ready(out)

    ref = reference_forward(x, jnp.asarray(W_pooled), jnp.asarray(bias),
                            num_rotations, out_features, padding)
    assert out.shape == (N, out_features * num_rotations, H, W)
    # bf16 MXU operands + f32 accumulation vs pure-f32 reference
    np.testing.assert_allclose(np.asarray(out), np.asarray(ref), atol=3e-2, rtol=3e-2)

    print("KERNEL_OK")
</pallas_src>

<mosaic_0001>
module attributes {stable_mosaic.version = 11 : i64} {
  func.func @_conv_stats_kernel(%arg0: i32, %arg1: memref<8x512xbf16, #tpu.memory_space<vmem>>, %arg2: memref<512x256xbf16, #tpu.memory_space<vmem>>, %arg3: memref<8x256xf32, #tpu.memory_space<vmem>>, %arg4: memref<1x8x256xf32, #tpu.memory_space<vmem>>) attributes {dimension_semantics = [#tpu.dimension_semantics<parallel>], iteration_bounds = array<i64: 4>, scalar_prefetch = 0 : i64, scratch_operands = 0 : i64, tpu.core_type = #tpu.core_type<tc>, window_params = [{transform_indices = @transform_0, window_bounds = array<i64: 8, 512>}, {pipeline_mode = #tpu.pipeline_mode<synchronous>, transform_indices = @transform_1, window_bounds = array<i64: 512, 256>}, {transform_indices = @transform_2, window_bounds = array<i64: 8, 256>}, {transform_indices = @transform_3, window_bounds = array<i64: 1, 8, 256>}]} {
    %c0 = arith.constant 0 : index
    %c0_0 = arith.constant 0 : index
    %0 = vector.load %arg1[%c0, %c0_0] : memref<8x512xbf16, #tpu.memory_space<vmem>>, vector<8x512xbf16>
    %c0_1 = arith.constant 0 : index
    %c0_2 = arith.constant 0 : index
    %1 = vector.load %arg2[%c0_1, %c0_2] : memref<512x256xbf16, #tpu.memory_space<vmem>>, vector<512x256xbf16>
    %cst = arith.constant dense<0.000000e+00> : vector<8x256xf32>
    %2 = tpu.matmul %0, %1, %cst {dimension_numbers = #tpu.dot_dimension_numbers<[1], [0], [0], [1], [0, 0, 1, 1], [], []>} : vector<8x512xbf16>, vector<512x256xbf16>, vector<8x256xf32> -> vector<8x256xf32>
    %c0_3 = arith.constant 0 : index
    %c0_4 = arith.constant 0 : index
    %3 = vector.load %arg3[%c0_3, %c0_4] : memref<8x256xf32, #tpu.memory_space<vmem>>, vector<8x256xf32>
    tpu.vector_store %arg3[%c0_3, %c0_4], %2 {strides = array<i32>} : memref<8x256xf32, #tpu.memory_space<vmem>>, vector<8x256xf32>,
    %cst_5 = arith.constant dense<0.000000e+00> : vector<256xf32>
    %4 = vector.multi_reduction <add>, %2, %cst_5 [0] : vector<8x256xf32> to vector<256xf32>
    %5 = vector.shape_cast %4 : vector<256xf32> to vector<1x256xf32>
    %6 = arith.mulf %2, %2 : vector<8x256xf32>
    %cst_6 = arith.constant dense<0.000000e+00> : vector<256xf32>
    %7 = vector.multi_reduction <add>, %6, %cst_6 [0] : vector<8x256xf32> to vector<256xf32>
    %8 = vector.shape_cast %7 : vector<256xf32> to vector<1x256xf32>
    %cst_7 = arith.constant 0.000000e+00 : f32
    %9 = vector.broadcast %cst_7 : f32 to vector<6x256xf32>
    %10 = tpu.concatenate %5, %8, %9 in 0 : vector<1x256xf32>, vector<1x256xf32>, vector<6x256xf32> -> vector<8x256xf32>
    %11 = vector.shape_cast %10 : vector<8x256xf32> to vector<1x8x256xf32>
    %c0_8 = arith.constant 0 : index
    %c0_9 = arith.constant 0 : index
    %c0_10 = arith.constant 0 : index
    %12 = vector.load %arg4[%c0_8, %c0_9, %c0_10] : memref<1x8x256xf32, #tpu.memory_space<vmem>>, vector<1x8x256xf32>
    tpu.vector_store %arg4[%c0_8, %c0_9, %c0_10], %11 {strides = array<i32>} : memref<1x8x256xf32, #tpu.memory_space<vmem>>, vector<1x8x256xf32>,
    return
  }
  func.func @transform_0(%arg0: i32) -> (i32, i32) {
    %c0_i32 = arith.constant 0 : i32
    %c0_i32_0 = arith.constant 0 : i32
    return %arg0, %c0_i32 : i32, i32
  }
  func.func @transform_1(%arg0: i32) -> (i32, i32) {
    %c0_i32 = arith.constant 0 : i32
    %c0_i32_0 = arith.constant 0 : i32
    %c0_i32_1 = arith.constant 0 : i32
    return %c0_i32, %c0_i32_0 : i32, i32
  }
  func.func @transform_2(%arg0: i32) -> (i32, i32) {
    %c0_i32 = arith.constant 0 : i32
    %c0_i32_0 = arith.constant 0 : i32
    return %arg0, %c0_i32 : i32, i32
  }
  func.func @transform_3(%arg0: i32) -> (i32, i32, i32) {
    %c0_i32 = arith.constant 0 : i32
    %c0_i32_0 = arith.constant 0 : i32
    %c0_i32_1 = arith.constant 0 : i32
    return %arg0, %c0_i32, %c0_i32_0 : i32, i32, i32
  }
}

module attributes {stable_mosaic.version = 11 : i64} {
  func.func @_bn_apply_kernel(%arg0: i32, %arg1: memref<8x256xf32, #tpu.memory_space<vmem>>, %arg2: memref<1x256xf32, #tpu.memory_space<vmem>>, %arg3: memref<1x256xf32, #tpu.memory_space<vmem>>, %arg4: memref<8x256xf32, #tpu.memory_space<vmem>>) attributes {dimension_semantics = [#tpu.dimension_semantics<parallel>], iteration_bounds = array<i64: 4>, scalar_prefetch = 0 : i64, scratch_operands = 0 : i64, tpu.core_type = #tpu.core_type<tc>, window_params = [{transform_indices = @transform_0, window_bounds = array<i64: 8, 256>}, {pipeline_mode = #tpu.pipeline_mode<synchronous>, transform_indices = @transform_1, window_bounds = array<i64: 1, 256>}, {pipeline_mode = #tpu.pipeline_mode<synchronous>, transform_indices = @transform_2, window_bounds = array<i64: 1, 256>}, {transform_indices = @transform_3, window_bounds = array<i64: 8, 256>}]} {
    %c0 = arith.constant 0 : index
    %c0_0 = arith.constant 0 : index
    %0 = vector.load %arg1[%c0, %c0_0] : memref<8x256xf32, #tpu.memory_space<vmem>>, vector<8x256xf32>
    %c0_1 = arith.constant 0 : index
    %c0_2 = arith.constant 0 : index
    %1 = vector.load %arg2[%c0_1, %c0_2] : memref<1x256xf32, #tpu.memory_space<vmem>>, vector<1x256xf32>
    %2 = vector.broadcast %1 : vector<1x256xf32> to vector<8x256xf32>
    %3 = arith.mulf %0, %2 : vector<8x256xf32>
    %c0_3 = arith.constant 0 : index
    %c0_4 = arith.constant 0 : index
    %4 = vector.load %arg3[%c0_3, %c0_4] : memref<1x256xf32, #tpu.memory_space<vmem>>, vector<1x256xf32>
    %5 = vector.broadcast %4 : vector<1x256xf32> to vector<8x256xf32>
    %6 = arith.addf %3, %5 : vector<8x256xf32>
    %c0_5 = arith.constant 0 : index
    %c0_6 = arith.constant 0 : index
    %7 = vector.load %arg4[%c0_5, %c0_6] : memref<8x256xf32, #tpu.memory_space<vmem>>, vector<8x256xf32>
    tpu.vector_store %arg4[%c0_5, %c0_6], %6 {strides = array<i32>} : memref<8x256xf32, #tpu.memory_space<vmem>>, vector<8x256xf32>,
    return
  }
  func.func @transform_0(%arg0: i32) -> (i32, i32) {
    %c0_i32 = arith.constant 0 : i32
    %c0_i32_0 = arith.constant 0 : i32
    return %arg0, %c0_i32 : i32, i32
  }
  func.func @transform_1(%arg0: i32) -> (i32, i32) {
    %c0_i32 = arith.constant 0 : i32
    %c0_i32_0 = arith.constant 0 : i32
    %c0_i32_1 = arith.constant 0 : i32
    return %c0_i32, %c0_i32_0 : i32, i32
  }
  func.func @transform_2(%arg0: i32) -> (i32, i32) {
    %c0_i32 = arith.constant 0 : i32
    %c0_i32_0 = arith.constant 0 : i32
    %c0_i32_1 = arith.constant 0 : i32
    return %c0_i32, %c0_i32_0 : i32, i32
  }
  func.func @transform_3(%arg0: i32) -> (i32, i32) {
    %c0_i32 = arith.constant 0 : i32
    %c0_i32_0 = arith.constant 0 : i32
    return %arg0, %c0_i32 : i32, i32
  }
}

</mosaic_0001>

<bundles_post_ra>
// kernel: squeeze.2
= control target key start
LH: loop header
LB: loop body
LE: loop exit
PB: predicated region body
PF: predicated region fallthrough
CT: control target
= control target key end

     0   :  { %s66_s8 = smov 80   ;;  %vm7_vm0 = vcmask 130048   ;;  %s67_s11 = smov 96   ;;  %s117_s0 = inlined_call_operand.vmem [shape: f32[256], index: 0, kind: input, shape index: {}]   ;;  %s118_s1 = inlined_call_operand.vmem [shape: f32[16,16], index: 1, kind: output, shape index: {}]  }
   0x1   :  { %v4_v0 = vld [vmem:[%s117_s0] sm:$0x3]  ;;  %s65_s0 = smov 112   ;;  %s68_s12 = smov 64  }
   0x2   :  { %5 = vst [vmem:[#allocation0] sm:$0x3] %v4_v0  ;;  %s69_s13 = smov 48   ;;  %s70_s14 = smov 32  }
   0x3   :  { %s71_s15 = smov 16  }
   0x9   :  { %v9_v1 = vld [vmem:[#allocation0] sm:$0x3]  }
   0xa   :  { %v21_v2 = vld [vmem:[#allocation0] sm:$0x3]   ;;  %10 = vrot.lane.b32.xlu0 %v9_v1, %s65_s0 }
   0xb   :  { %22 = vrot.lane.b32.xlu1 %v21_v2, %s66_s8  ;;  %v15_v3 = vld [vmem:[#allocation0] sm:$0x3]  }
   0xc   :  { %v27_v4 = vld [vmem:[#allocation0] sm:$0x3]  }
   0xd   :  { %v6_v5 = vld [vmem:[#allocation0] sm:$0x3]  }
   0xe   :  { %8 = vst.msk [vmem:[%s118_s1] ss:$8 sm:$0x3] %vm7_vm0, %v6_v5   ;;  %16 = vrot.lane.b32.xlu0 %v15_v3, %s67_s11  ;;  %v33_v6 = vld [vmem:[#allocation0] sm:$0x3]  }
   0xf   :  { %28 = vrot.lane.b32.xlu1 %v27_v4, %s68_s12  ;;  %v39_v7 = vld [vmem:[#allocation0] sm:$0x3]  }
  0x10   :  { %v45_v8 = vld [vmem:[#allocation0] sm:$0x3]  }
  0x12   :  { %34 = vrot.lane.b32.xlu0 %v33_v6, %s69_s13 }
  0x13   :  { %40 = vrot.lane.b32.xlu1 %v39_v7, %s70_s14 }
  0x16   :  { %46 = vrot.lane.b32.xlu0 %v45_v8, %s71_s15 }
  0x7c   :  { %v11_v9 = vpop.permute.xlu0 %10  }
  0x7d   :  { %v23_v10 = vpop.permute.xlu1 %22   ;;  %51 = vst.msk [vmem:[%s118_s1 + $0x1] ss:$8 sm:$0x3] %vm7_vm0, %v11_v9  }
  0x7e   :  { %53 = vst.msk [vmem:[%s118_s1 + $0x3] ss:$8 sm:$0x3] %vm7_vm0, %v23_v10  }
  0x80   :  { %v17_v11 = vpop.permute.xlu0 %16  }
  0x81   :  { %v29_v12 = vpop.permute.xlu1 %28   ;;  %52 = vst.msk [vmem:[%s118_s1 + $0x2] ss:$8 sm:$0x3] %vm7_vm0, %v17_v11  }
  0x82   :  { %54 = vst.msk [vmem:[%s118_s1 + $0x4] ss:$8 sm:$0x3] %vm7_vm0, %v29_v12  }
  0x84   :  { %v35_v13 = vpop.permute.xlu0 %34  }
  0x85   :  { %v41_v14 = vpop.permute.xlu1 %40   ;;  %55 = vst.msk [vmem:[%s118_s1 + $0x5] ss:$8 sm:$0x3] %vm7_vm0, %v35_v13  }
  0x86   :  { %56 = vst.msk [vmem:[%s118_s1 + $0x6] ss:$8 sm:$0x3] %vm7_vm0, %v41_v14  }
  0x88   :  { %v47_v15 = vpop.permute.xlu0 %46  }
  0x89   :  { %57 = vst.msk [vmem:[%s118_s1 + $0x7] ss:$8 sm:$0x3] %vm7_vm0, %v47_v15  }

// kernel: tile.9
= control target key start
LH: loop header
LB: loop body
LE: loop exit
PB: predicated region body
PF: predicated region fallthrough
CT: control target
= control target key end

     0   :  { %vm7_vm0 = vcmask 31744   ;;  %s37_s8 = smov 4   ;;  %s38_s9 = smov 8   ;;  %vm13_vm1 = vcmask 130144   ;;  %vm19_vm2 = vcmask 97344   ;;  %vm25_vm3 = vcmask 64544   ;;  %s55_s0 = inlined_call_operand.vmem [shape: f32[4,4], index: 0, kind: input, shape index: {}]   ;;  %s56_s1 = inlined_call_operand.vmem [shape: f32[16], index: 1, kind: output, shape index: {}]  }
   0x1   :  { %v4_v0 = vld [vmem:[%s55_s0] sm:$0xf]  ;;  %s36_s0 = smov 12  }
   0x2   :  { %5 = vst [vmem:[#allocation1] sm:$0xf] %v4_v0 }
   0x9   :  { %v10_v1 = vld [vmem:[#allocation1 + $0x3] sm:$0x1]   ;;  %v22_v2 = vld [vmem:[#allocation1 + $0x1] sm:$0x1]   ;;  %v6_v3 = vld [vmem:[#allocation1] sm:$0x1]  }
   0xa   :  { %11 = vrot.lane.b32.xlu0 %v10_v1, %s36_s0  ;;  %23 = vrot.lane.b32.xlu1 %v22_v2, %s37_s8  ;;  %v16_v4 = vld [vmem:[#allocation1 + $0x2] sm:$0x1]   ;;  %8 = vst.msk [vmem:[#allocation0] sm:$0x1] %vm7_vm0, %v6_v3  }
   0xe   :  { %17 = vrot.lane.b32.xlu0 %v16_v4, %s38_s9 }
  0x7c   :  { %v12_v5 = vpop.permute.xlu0 %11   ;;  %v24_v6 = vpop.permute.xlu1 %23  }
  0x7d   :  { %14 = vst.msk [vmem:[#allocation0] sm:$0x1] %vm13_vm1, %v12_v5  }
  0x80   :  { %v18_v7 = vpop.permute.xlu0 %17  }
  0x81   :  { %20 = vst.msk [vmem:[#allocation0] sm:$0x1] %vm19_vm2, %v18_v7  }
  0x82   :  { %26 = vst.msk [vmem:[#allocation0] sm:$0x1] %vm25_vm3, %v24_v6  }
  0x89   :  { %v30_v8 = vld [vmem:[#allocation0] sm:$0x1] }
  0x8a   :  { %32 = vst [vmem:[%s56_s1] sm:$0x1] %v30_v8 }

// kernel: tile.10
= control target key start
LH: loop header
LB: loop body
LE: loop exit
PB: predicated region body
PF: predicated region fallthrough
CT: control target
= control target key end

     0   :  { %s28_s0 = inlined_call_operand.vmem [shape: f32[16], index: 0, kind: input, shape index: {}]   ;;  %s29_s1 = inlined_call_operand.vmem [shape: f32[16,16], index: 1, kind: output, shape index: {}]  }
   0x1   :  { %v4_v0 = vld [vmem:[%s28_s0] ss:$0 sm:$0xff] }
   0x2   :  { %5 = vst [vmem:[%s29_s1] sm:$0xff] %v4_v0  ;;  %8 = vst [vmem:[%s29_s1 + $0x8] sm:$0xff] %v4_v0 }

// kernel: tile.11
= control target key start
LH: loop header
LB: loop body
LE: loop exit
PB: predicated region body
PF: predicated region fallthrough
CT: control target
= control target key end

     0   :  { %s7_s6 = smov 3  ;;  %s21_s9 = smov 3  ;;  %vm4_vm0 = vcmask 130048   ;;  %vm11_vm1 = vcmask 1048448   ;;  %vm18_vm2 = vcmask 917248   ;;  %vm25_vm3 = vcmask 786048   ;;  %s128_s0 = inlined_call_operand.vmem [shape: f32[16,16], index: 0, kind: input, shape index: {}]   ;;  %s129_s1 = inlined_call_operand.vmem [shape: f32[1,256], index: 1, kind: output, shape index: {}]  }
   0x1   :  { %v66_v0 = vld [vmem:[%s128_s0 + $0x7] ss:$8 sm:%s7_s6]   ;;  %s81_s10 = smov 112   ;;  %v68_v1 = vld [vmem:[%s128_s0 + $0x5] ss:$8 sm:%s21_s9]   ;;  %s14_s13 = smov 3 }
   0x2   :  { %9 = vrot.lane.b32.xlu0 %v66_v0, %s81_s10  ;;  %s82_s14 = smov 80   ;;  %v67_v2 = vld [vmem:[%s128_s0 + $0x6] ss:$8 sm:%s14_s13]   ;;  %s28_s17 = smov 3  ;;  %vm32_vm4 = vcmask 654848   ;;  %vm39_vm5 = vcmask 523648  }
   0x3   :  { %23 = vrot.lane.b32.xlu1 %v68_v1, %s82_s14  ;;  %v69_v3 = vld [vmem:[%s128_s0 + $0x4] ss:$8 sm:%s28_s17]   ;;  %s35_s20 = smov 3  ;;  %s42_s21 = smov 3  ;;  %vm46_vm6 = vcmask 392448   ;;  %vm53_vm7 = vcmask 261248  }
   0x4   :  { %s83_s22 = smov 96   ;;  %s84_s23 = smov 64   ;;  %v70_v4 = vld [vmem:[%s128_s0 + $0x3] ss:$8 sm:%s35_s20]   ;;  %v71_v5 = vld [vmem:[%s128_s0 + $0x2] ss:$8 sm:%s42_s21]  }
   0x5   :  { %s2_s26 = smov 3  ;;  %s49_s29 = smov 3 }
   0x6   :  { %16 = vrot.lane.b32.xlu0 %v67_v2, %s83_s22  ;;  %v3_v6 = vld [vmem:[%s128_s0] ss:$8 sm:%s2_s26]   ;;  %s85_s3 = smov 48   ;;  %s86_s4 = smov 32  }
   0x7   :  { %30 = vrot.lane.b32.xlu1 %v69_v3, %s84_s23  ;;  %5 = vst.msk [vmem:[#allocation0] ss:$8 sm:$0x3] %vm4_vm0, %v3_v6   ;;  %v72_v7 = vld [vmem:[%s128_s0 + $0x1] ss:$8 sm:%s49_s29]   ;;  %s87_s0 = smov 16  }
   0xa   :  { %37 = vrot.lane.b32.xlu0 %v70_v4, %s85_s3 }
   0xb   :  { %44 = vrot.lane.b32.xlu1 %v71_v5, %s86_s4 }
   0xe   :  { %51 = vrot.lane.b32.xlu0 %v72_v7, %s87_s0 }
  0x74   :  { %v10_v8 = vpop.permute.xlu0 %9  }
  0x75   :  { %12 = vst.msk [vmem:[#allocation0] ss:$8 sm:$0x3] %vm11_vm1, %v10_v8   ;;  %v24_v9 = vpop.permute.xlu1 %23  }
  0x78   :  { %v17_v10 = vpop.permute.xlu0 %16  }
  0x79   :  { %19 = vst.msk [vmem:[#allocation0] ss:$8 sm:$0x3] %vm18_vm2, %v17_v10   ;;  %v31_v11 = vpop.permute.xlu1 %30  }
  0x7a   :  { %26 = vst.msk [vmem:[#allocation0] ss:$8 sm:$0x3] %vm25_vm3, %v24_v9  }
  0x7b   :  { %33 = vst.msk [vmem:[#allocation0] ss:$8 sm:$0x3] %vm32_vm4, %v31_v11  }
  0x7c   :  { %v38_v12 = vpop.permute.xlu0 %37  }
  0x7d   :  { %40 = vst.msk [vmem:[#allocation0] ss:$8 sm:$0x3] %vm39_vm5, %v38_v12   ;;  %v45_v13 = vpop.permute.xlu1 %44  }
  0x7e   :  { %47 = vst.msk [vmem:[#allocation0] ss:$8 sm:$0x3] %vm46_vm6, %v45_v13  }
  0x80   :  { %v52_v14 = vpop.permute.xlu0 %51  }
  0x81   :  { %54 = vst.msk [vmem:[#allocation0] ss:$8 sm:$0x3] %vm53_vm7, %v52_v14  }
  0x88   :  { %v58_v15 = vld [vmem:[#allocation0] sm:$0x1]  ;;  %v62_v16 = vld [vmem:[#allocation0 + $0x8] sm:$0x1] }
  0x89   :  { %60 = vst [vmem:[%s129_s1] sm:$0x1] %v58_v15  ;;  %73 = vst [vmem:[%s129_s1 + $0x1] sm:$0x1] %v62_v16 }

// kernel: rot_equi_conv2d_forward.2
= control target key start
LH: loop header
LB: loop body
LE: loop exit
PB: predicated region body
PF: predicated region fallthrough
CT: control target
= control target key end

     0   :  { %s1012_s12 = smov 0   ;;  %s1233_s0 = inlined_call_operand.vmem [shape: bf16[32,512], index: 0, kind: input, shape index: {}]   ;;  %s1234_s1 = inlined_call_operand.vmem [shape: bf16[512,256], index: 1, kind: input, shape index: {}]   ;;  %s1235_s2 = inlined_call_operand.vmem [shape: f32[32,256], index: 2, kind: output, shape index: {0}]   ;;  %s1236_s3 = inlined_call_operand.vmem [shape: f32[4,8,256], index: 3, kind: output, shape index: {1}]  }
   0x1 LB: > { %s790_s13 = sadd.s32 4294967295, %s990_s12   ;;  %p794_p0 = scmp.ge.s32.totalorder %s990_s12, 1  ;;  %s990_s12 = sphi %s1012_s12, %s14_s12  }
   0x2   : > { %p140_p1 = scmp.lt.s32.totalorder %s990_s12, 5 }
   0x4   : > { %p141_p2 = pnand %p794_p0, %p140_p1 }
   0x5   : > { %v884_v0 = vld [vmem:[%s1234_s1 + $0x4] ss:$8 sps:$4 sm:$0xff] (!%p141_p2)   ;;  %v888_v2 = vld [vmem:[%s1234_s1] ss:$8 sps:$4 sm:$0xff] (!%p141_p2)   ;;  %v890_v4 = vld [vmem:[%s1234_s1 + $0x14] ss:$8 sps:$4 sm:$0xff] (!%p141_p2)  }
   0x6   : > { %144 = sbr.rel (%p141_p2) target bundleno = 303 (0x12f), region = 28  ;;  %v886_v1 = vld [vmem:[%s1234_s1 + $0x104] ss:$8 sps:$4 sm:$0xff] (!%p141_p2)   ;;  %584 = vmatprep.subr.bf16.mxu1 (!%p141_p2), %v884_v0  ;;  %v889_v3 = vld [vmem:[%s1234_s1 + $0x100] ss:$8 sps:$4 sm:$0xff] (!%p141_p2)   ;;  %p169_p3 = scmp.lt.s32.totalorder (!%p141_p2), %s790_s13, 3 }
   0x7   : > { %625 = vmatprep.subr.bf16.mxu0 (!%p141_p2), %v886_v1  ;;  %585 = vmatpush1.bf16.msra.mxu1 (!%p141_p2), %v888_v2  ;;  %v892_v5 = vld [vmem:[%s1234_s1 + $0x114] ss:$8 sps:$4 sm:$0xff] (!%p141_p2)   ;;  %v894_v6 = vld [vmem:[%s1234_s1 + $0x10] ss:$8 sps:$4 sm:$0xff] (!%p141_p2)   ;;  %v896_v8 = vld [vmem:[%s1234_s1 + $0x24] ss:$8 sps:$4 sm:$0xff] (!%p141_p2)  }
   0x8   : > { %626 = vmatpush1.bf16.msra.mxu0 (!%p141_p2), %v889_v3  ;;  %586 = vmatprep.subr.bf16.mxu1 (!%p141_p2), %v890_v4  ;;  %v895_v7 = vld [vmem:[%s1234_s1 + $0x110] ss:$8 sps:$4 sm:$0xff] (!%p141_p2)   ;;  %v898_v9 = vld [vmem:[%s1234_s1 + $0x124] ss:$8 sps:$4 sm:$0xff] (!%p141_p2)   ;;  %v900_v10 = vld [vmem:[%s1234_s1 + $0x20] ss:$8 sps:$4 sm:$0xff] (!%p141_p2)  }
   0x9   : > { %627 = vmatprep.subr.bf16.mxu0 (!%p141_p2), %v892_v5  ;;  %v901_v11 = vld [vmem:[%s1234_s1 + $0x120] ss:$8 sps:$4 sm:$0xff] (!%p141_p2)   ;;  %v902_v12 = vld [vmem:[%s1234_s1 + $0x34] ss:$8 sps:$4 sm:$0xff] (!%p141_p2)   ;;  %v906_v14 = vld [vmem:[%s1234_s1 + $0x30] ss:$8 sps:$4 sm:$0xff] (!%p141_p2)  }
   0xa   : > { %v904_v13 = vld [vmem:[%s1234_s1 + $0x134] ss:$8 sps:$4 sm:$0xff] (!%p141_p2)   ;;  %v907_v15 = vld [vmem:[%s1234_s1 + $0x130] ss:$8 sps:$4 sm:$0xff] (!%p141_p2)   ;;  %v908_v16 = vld [vmem:[%s1234_s1 + $0x44] ss:$8 sps:$4 sm:$0xff] (!%p141_p2)  }
   0xb   : > { %587 = vmatpush1.bf16.msra.mxu1 (!%p141_p2), %v894_v6  ;;  %v910_v17 = vld [vmem:[%s1234_s1 + $0x144] ss:$8 sps:$4 sm:$0xff] (!%p141_p2)   ;;  %v912_v18 = vld [vmem:[%s1234_s1 + $0x40] ss:$8 sps:$4 sm:$0xff] (!%p141_p2)   ;;  %v914_v20 = vld [vmem:[%s1234_s1 + $0x54] ss:$8 sps:$4 sm:$0xff] (!%p141_p2)  }
   0xc   : > { %628 = vmatpush1.bf16.msra.mxu0 (!%p141_p2), %v895_v7  ;;  %588 = vmatprep.subr.bf16.mxu1 (!%p141_p2), %v896_v8  ;;  %v913_v19 = vld [vmem:[%s1234_s1 + $0x140] ss:$8 sps:$4 sm:$0xff] (!%p141_p2)   ;;  %v916_v21 = vld [vmem:[%s1234_s1 + $0x154] ss:$8 sps:$4 sm:$0xff] (!%p141_p2)   ;;  %v918_v22 = vld [vmem:[%s1234_s1 + $0x50] ss:$8 sps:$4 sm:$0xff] (!%p141_p2)  }
   0xd   : > { %629 = vmatprep.subr.bf16.mxu0 %v898_v9  ;;  %v919_v23 = vld [vmem:[%s1234_s1 + $0x150] ss:$8 sps:$4 sm:$0xff]   ;;  %v920_v24 = vld [vmem:[%s1234_s1 + $0x64] ss:$8 sps:$4 sm:$0xff]   ;;  %v924_v26 = vld [vmem:[%s1234_s1 + $0x60] ss:$8 sps:$4 sm:$0xff]  }
   0xe   : > { %v922_v25 = vld [vmem:[%s1234_s1 + $0x164] ss:$8 sps:$4 sm:$0xff]   ;;  %v925_v27 = vld [vmem:[%s1234_s1 + $0x160] ss:$8 sps:$4 sm:$0xff]   ;;  %v926_v28 = vld [vmem:[%s1234_s1 + $0x74] ss:$8 sps:$4 sm:$0xff]  }
   0xf   : > { %589 = vmatpush1.bf16.msra.mxu1 %v900_v10  ;;  %v928_v29 = vld [vmem:[%s1234_s1 + $0x174] ss:$8 sps:$4 sm:$0xff]   ;;  %v930_v30 = vld [vmem:[%s1234_s1 + $0x70] ss:$8 sps:$4 sm:$0xff]   ;;  %v932_v32 = vld [vmem:[%s1234_s1 + $0x84] ss:$8 sps:$4 sm:$0xff]  }
  0x10   : > { %630 = vmatpush1.bf16.msra.mxu0 %v901_v11  ;;  %590 = vmatprep.subr.bf16.mxu1 %v902_v12  ;;  %v931_v31 = vld [vmem:[%s1234_s1 + $0x170] ss:$8 sps:$4 sm:$0xff]   ;;  %v934_v33 = vld [vmem:[%s1234_s1 + $0x184] ss:$8 sps:$4 sm:$0xff]   ;;  %v936_v34 = vld [vmem:[%s1234_s1 + $0x80] ss:$8 sps:$4 sm:$0xff]  }
  0x11   : > { %631 = vmatprep.subr.bf16.mxu0 %v904_v13  ;;  %v937_v35 = vld [vmem:[%s1234_s1 + $0x180] ss:$8 sps:$4 sm:$0xff]   ;;  %v938_v36 = vld [vmem:[%s1234_s1 + $0x94] ss:$8 sps:$4 sm:$0xff]   ;;  %s1238_s13 = smov (!%p169_p3, %s790_s13), 3  ;;  %vm694_vm0 = vcmask 1040384  }
  0x12   : > { %v940_v37 = vld [vmem:[%s1234_s1 + $0x194] ss:$8 sps:$4 sm:$0xff]   ;;  %v942_v38 = vld [vmem:[%s1234_s1 + $0x90] ss:$8 sps:$4 sm:$0xff]   ;;  %v944_v40 = vld [vmem:[%s1234_s1 + $0xa4] ss:$8 sps:$4 sm:$0xff]  }
  0x13   : > { %591 = vmatpush1.bf16.msra.mxu1 %v906_v14  ;;  %v943_v39 = vld [vmem:[%s1234_s1 + $0x190] ss:$8 sps:$4 sm:$0xff]   ;;  %s1147_s21 = sshll.u32 %s1238_s13, 4  ;;  %v946_v41 = vld [vmem:[%s1234_s1 + $0x1a4] ss:$8 sps:$4 sm:$0xff]   ;;  %vm697_vm1 = vcmask 1041408  }
  0x14   : > { %632 = vmatpush1.bf16.msra.mxu0 %v907_v15  ;;  %592 = vmatprep.subr.bf16.mxu1 %v908_v16  ;;  %v948_v42 = vld [vmem:[%s1234_s1 + $0xa0] ss:$8 sps:$4 sm:$0xff]   ;;  %s173_s13 = scalar_lea.vmem %s1233_s0, %s1147_s21  ;;  %v950_v44 = vld [vmem:[%s1234_s1 + $0xb4] ss:$8 sps:$4 sm:$0xff]   ;;  %v954_v49 = vld [vmem:[%s1234_s1 + $0xb0] ss:$8 sps:$4 sm:$0xff]   ;;  %s178_s23 = scalar_lea.vmem %s1235_s2, %s1147_s21 }
  0x15   : > { %633 = vmatprep.subr.bf16.mxu0 %v910_v17  ;;  %v949_v43 = vld [vmem:[%s1234_s1 + $0x1a0] ss:$8 sps:$4 sm:$0xff]   ;;  %v952_v45 = vld [vmem:[%s1234_s1 + $0x1b4] ss:$8 sps:$4 sm:$0xff]   ;;  %v955_v50 = vld [vmem:[%s1234_s1 + $0x1b0] ss:$8 sps:$4 sm:$0xff]   ;;  %s183_s26 = scalar_lea.vmem %s1236_s3, %s1147_s21 }
  0x16   : > { %v184_v46 = vld [vmem:[%s173_s13] sm:$0xff]  ;;  %v185_v48 = vld [vmem:[%s173_s13 + $0x8] sm:$0xff]  ;;  %v962_v56 = vld [vmem:[%s1234_s1 + $0xd4] ss:$8 sps:$4 sm:$0xff]  }
  0x17   : > { %593 = vmatpush1.bf16.msra.mxu1 %v912_v18  ;;  %v802_v47 = vcombine.high %v184_v46, %v184_v46  ;;  %v804_v51 = vcombine.high %v185_v48, %v185_v48  ;;  %v956_v52 = vld [vmem:[%s1234_s1 + $0xc4] ss:$8 sps:$4 sm:$0xff]   ;;  %v960_v54 = vld [vmem:[%s1234_s1 + $0xc0] ss:$8 sps:$4 sm:$0xff]   ;;  %v964_v57 = vld [vmem:[%s1234_s1 + $0x1d4] ss:$8 sps:$4 sm:$0xff]   ;;  %v801_v4 = vcombine.low %v184_v46, %v184_v46  ;;  %v803_v5 = vcombine.low %v185_v48, %v185_v48 }
  0x18   : > { %634 = vmatpush1.bf16.msra.mxu0 %v913_v19  ;;  %594 = vmatprep.subr.bf16.mxu1 %v914_v20  ;;  %v958_v53 = vld [vmem:[%s1234_s1 + $0x1c4] ss:$8 sps:$4 sm:$0xff]   ;;  %v961_v55 = vld [vmem:[%s1234_s1 + $0x1c0] ss:$8 sps:$4 sm:$0xff]   ;;  %v966_v58 = vld [vmem:[%s1234_s1 + $0xd0] ss:$8 sps:$4 sm:$0xff]  }
  0x19   : > { %635 = vmatprep.subr.bf16.mxu0 %v916_v21  ;;  %616 = vmatprep.mubr.bf16.mxu1 %v802_v47  ;;  %v967_v59 = vld [vmem:[%s1234_s1 + $0x1d0] ss:$8 sps:$4 sm:$0xff]   ;;  %v968_v60 = vld [vmem:[%s1234_s1 + $0xe4] ss:$8 sps:$4 sm:$0xff]   ;;  %v972_v62 = vld [vmem:[%s1234_s1 + $0xe0] ss:$8 sps:$4 sm:$0xff]  }
  0x1a   : > { %657 = vmatprep.mubr.bf16.mxu0 %v804_v51  ;;  %v970_v61 = vld [vmem:[%s1234_s1 + $0x1e4] ss:$8 sps:$4 sm:$0xff]   ;;  %v973_v63 = vld [vmem:[%s1234_s1 + $0x1e0] ss:$8 sps:$4 sm:$0xff]   ;;  %v974_v0 = vld [vmem:[%s1234_s1 + $0xf4] ss:$8 sps:$4 sm:$0xff]  }
  0x1b   : > { %595 = vmatpush1.bf16.msra.mxu1 %v918_v22  ;;  %v976_v1 = vld [vmem:[%s1234_s1 + $0x1f4] ss:$8 sps:$4 sm:$0xff]   ;;  %v978_v2 = vld [vmem:[%s1234_s1 + $0xf0] ss:$8 sps:$4 sm:$0xff]  }
  0x1c   : > { %636 = vmatpush1.bf16.msra.mxu0 %v919_v23  ;;  %596 = vmatprep.subr.bf16.mxu1 %v920_v24  ;;  %v979_v3 = vld [vmem:[%s1234_s1 + $0x1f0] ss:$8 sps:$4 sm:$0xff]  }
  0x1d   : > { %637 = vmatprep.subr.bf16.mxu0 %v922_v25 }
  0x1f   : > { %597 = vmatpush1.bf16.msra.mxu1 %v924_v26 }
  0x20   : > { %638 = vmatpush1.bf16.msra.mxu0 %v925_v27  ;;  %598 = vmatprep.subr.bf16.mxu1 %v926_v28 }
  0x21   : > { %639 = vmatprep.subr.bf16.mxu0 %v928_v29 }
  0x23   : > { %599 = vmatpush1.bf16.msra.mxu1 %v930_v30 }
  0x24   : > { %640 = vmatpush1.bf16.msra.mxu0 %v931_v31  ;;  %600 = vmatprep.subr.bf16.mxu1 %v932_v32 }
  0x25   : > { %641 = vmatprep.subr.bf16.mxu0 %v934_v33 }
  0x27   : > { %601 = vmatpush1.bf16.msra.mxu1 %v936_v34 }
  0x28   : > { %642 = vmatpush1.bf16.msra.mxu0 %v937_v35  ;;  %602 = vmatprep.subr.bf16.mxu1 %v938_v36 }
  0x29   : > { %643 = vmatprep.subr.bf16.mxu0 %v940_v37 }
  0x2b   : > { %603 = vmatpush1.bf16.msra.mxu1 %v942_v38 }
  0x2c   : > { %644 = vmatpush1.bf16.msra.mxu0 %v943_v39  ;;  %604 = vmatprep.subr.bf16.mxu1 %v944_v40 }
  0x2d   : > { %645 = vmatprep.subr.bf16.mxu0 %v946_v41 }
  0x2f   : > { %605 = vmatpush1.bf16.msra.mxu1 %v948_v42 }
  0x30   : > { %646 = vmatpush1.bf16.msra.mxu0 %v949_v43  ;;  %606 = vmatprep.subr.bf16.mxu1 %v950_v44 }
  0x31   : > { %647 = vmatprep.subr.bf16.mxu0 %v952_v45 }
  0x33   : > { %607 = vmatpush1.bf16.msra.mxu1 %v954_v49 }
  0x34   : > { %648 = vmatpush1.bf16.msra.mxu0 %v955_v50  ;;  %608 = vmatprep.subr.bf16.mxu1 %v956_v52 }
  0x35   : > { %649 = vmatprep.subr.bf16.mxu0 %v958_v53 }
  0x37   : > { %609 = vmatpush1.bf16.msra.mxu1 %v960_v54 }
  0x38   : > { %650 = vmatpush1.bf16.msra.mxu0 %v961_v55  ;;  %610 = vmatprep.subr.bf16.mxu1 %v962_v56 }
  0x39   : > { %651 = vmatprep.subr.bf16.mxu0 %v964_v57 }
  0x3b   : > { %611 = vmatpush1.bf16.msra.mxu1 %v966_v58 }
  0x3c   : > { %652 = vmatpush1.bf16.msra.mxu0 %v967_v59  ;;  %612 = vmatprep.subr.bf16.mxu1 %v968_v60 }
  0x3d   : > { %653 = vmatprep.subr.bf16.mxu0 %v970_v61 }
  0x3f   : > { %613 = vmatpush1.bf16.msra.mxu1 %v972_v62 }
  0x40   : > { %654 = vmatpush1.bf16.msra.mxu0 %v973_v63  ;;  %614 = vmatprep.subr.bf16.mxu1 %v974_v0 }
  0x41   : > { %655 = vmatprep.subr.bf16.mxu0 %v976_v1 }
  0x43   : > { %615 = vmatpush1.bf16.msra.mxu1 %v978_v2 }
  0x44   : > { %656 = vmatpush1.bf16.msra.mxu0 %v979_v3 }
  0x46   : > { %617 = vmatmul.mubr.bf16.vlgmr.msra.gmra.mrb[0].mxu1 %v801_v4 }
  0x47   : > { %658 = vmatmul.mubr.bf16.vlgmr.msra.gmra.mrb[0].mxu0 %v803_v5 }
 0x119   : > { %v618_v6 = vpop.f32.mrb[0].mxu1 }
 0x11a   : > { %v659_v7 = vpop.f32.mrb[0].mxu0  ;;  %v620_v9 = vpop.f32.mrb[1].mxu1 }
 0x11b   : > { %v660_v8 = vadd.f32 %v659_v7, %v618_v6  ;;  %v661_v10 = vpop.f32.mrb[1].mxu0  ;;  %v622_v12 = vpop.f32.mrb[2].mxu1 }
 0x11c   : > { %v662_v11 = vadd.f32 %v661_v10, %v620_v9  ;;  %v663_v13 = vpop.f32.mrb[2].mxu0  ;;  %v623_v16 = vpop.f32.mrb[3].mxu1 }
 0x11d   : > { %666 = vst [vmem:[%s178_s23] sm:$0xff] %v660_v8  ;;  %v668_v14 = vrot.slane %v660_v8, 4  ;;  %v680_v15 = vmul.f32 %v660_v8, %v660_v8  ;;  %v664_v17 = vpop.f32.mrb[3].mxu0 }
 0x11e   : > { %667 = vst [vmem:[%s178_s23 + $0x8] sm:$0xff] %v662_v11  ;;  %v674_v18 = vrot.slane %v662_v11, 4  ;;  %v681_v19 = vmul.f32 %v662_v11, %v662_v11 }
 0x11f   : > { %v669_v20 = vadd.f32 %v668_v14, %v660_v8  ;;  %v682_v21 = vrot.slane %v680_v15, 4 }
 0x120   : > { %v675_v22 = vadd.f32 %v674_v18, %v662_v11  ;;  %v688_v23 = vrot.slane %v681_v19, 4 }
 0x121   : > { %v670_v24 = vrot.slane %v669_v20, 2  ;;  %v683_v25 = vadd.f32 %v682_v21, %v680_v15 }
 0x122   : > { %v676_v26 = vrot.slane %v675_v22, 2  ;;  %v689_v27 = vadd.f32 %v688_v23, %v681_v19 }
 0x123   : > { %v671_v28 = vadd.f32 %v670_v24, %v669_v20  ;;  %v684_v29 = vrot.slane %v683_v25, 2 }
 0x124   : > { %v677_v30 = vadd.f32 %v676_v26, %v675_v22  ;;  %v690_v31 = vrot.slane %v689_v27, 2 }
 0x125   : > { %v672_v32 = vrot.slane %v671_v28, 1  ;;  %v685_v33 = vadd.f32 %v684_v29, %v683_v25 }
 0x126   : > { %v678_v34 = vrot.slane %v677_v30, 1  ;;  %v691_v35 = vadd.f32 %v690_v31, %v689_v27 }
 0x127   : > { %v686_v36 = vrot.slane %v685_v33, 1  ;;  %v673_v38 = vadd.f32 %v672_v32, %v671_v28 }
 0x128   : > { %v692_v37 = vrot.slane %v691_v35, 1  ;;  %v679_v40 = vadd.f32 %v678_v34, %v677_v30 }
 0x129   : > { %v687_v39 = vadd.f32 %v686_v36, %v685_v33 }
 0x12a   : > { %v693_v41 = vadd.f32 %v692_v37, %v691_v35 }
 0x12b   : > { %v695_v42 = vsel %vm694_vm0, %v673_v38, %v687_v39 }
 0x12c   : > { %v698_v43 = vsel %vm697_vm1, %v695_v42, 0.0  ;;  %v696_v44 = vsel %vm694_vm0, %v679_v40, %v693_v41 }
 0x12d   : > { %700 = vst [vmem:[%s183_s26] sm:$0xff] %v698_v43  ;;  %v699_v45 = vsel %vm697_vm1, %v696_v44, 0.0 }
 0x12e   : > { %701 = vst [vmem:[%s183_s26 + $0x8] sm:$0xff] %v699_v45 }
 0x12f PF: > { %s14_s12 = sadd.s32 1, %s990_s12  }
 0x130   : > { %p11_p4 = scmp.ge.s32.totalorder %s14_s12, 6  }
 0x132   :  { %13 = sbr.rel (!%p11_p4) target bundleno = 1 (0x1), region = 70 }

// kernel: rot_equi_conv2d_forward.3
= control target key start
LH: loop header
LB: loop body
LE: loop exit
PB: predicated region body
PF: predicated region fallthrough
CT: control target
= control target key end

     0   :  { %s307_s12 = smov 0   ;;  %s330_s0 = inlined_call_operand.vmem [shape: f32[32,256], index: 0, kind: input, shape index: {}]   ;;  %s331_s1 = inlined_call_operand.vmem [shape: f32[1,256], index: 1, kind: input, shape index: {}]   ;;  %s332_s2 = inlined_call_operand.vmem [shape: f32[1,256], index: 2, kind: input, shape index: {}]   ;;  %s333_s3 = inlined_call_operand.vmem [shape: f32[32,256], index: 3, kind: output, shape index: {}]  }
   0x1 LB: > { %s258_s13 = sadd.s32 4294967295, %s285_s12   ;;  %p262_p0 = scmp.ge.s32.totalorder %s285_s12, 1  ;;  %s285_s12 = sphi %s307_s12, %s13_s12  }
   0x2   : > { %p137_p1 = scmp.lt.s32.totalorder %s285_s12, 5 }
   0x4   : > { %p138_p2 = pnand %p262_p0, %p137_p1 }
   0x5   : > { %p161_p3 = scmp.lt.s32.totalorder (!%p138_p2), %s258_s13, 3  ;;  %v175_v0 = vlaneseq (!%p138_p2)  ;;  %v173_v2 = vld [vmem:[%s331_s1] sm:$0x3] (!%p138_p2) }
   0x6   : > { %141 = sbr.rel (%p138_p2) target bundleno = 22 (0x16), region = 32  ;;  %v187_v3 = vld [vmem:[%s332_s2] sm:$0x3] (!%p138_p2) }
   0x7   : > { %v176_v1 = vshrl.u32 (!%p138_p2), %v175_v0, 7 }
   0x9   : > { %v177_v4 = vsub.s32 (!%p138_p2), 0, %v176_v1  ;;  %v181_v5 = vsub.s32 (!%p138_p2), 1, %v176_v1 }
   0xb   : > { %v178_v8 = vrot.slane (!%p138_p2), %v173_v2, %v177_v4  ;;  %v192_v9 = vrot.slane (!%p138_p2), %v187_v3, %v177_v4  ;;  %v182_v10 = vrot.slane (!%p138_p2), %v173_v2, %v181_v5  ;;  %v196_v11 = vrot.slane (!%p138_p2), %v187_v3, %v181_v5 }
   0xd   : > { %s335_s13 = smov (!%p161_p3, %s258_s13), 3 }
   0xe   : > { %s269_s18 = sshll.u32 %s335_s13, 4 }
   0xf   : > { %s165_s21 = scalar_lea.vmem %s330_s0, %s269_s18  ;;  %s170_s24 = scalar_lea.vmem %s333_s3, %s269_s18 }
  0x10   : > { %v171_v6 = vld [vmem:[%s165_s21] sm:$0xff]  ;;  %v172_v7 = vld [vmem:[%s165_s21 + $0x8] sm:$0xff] }
  0x11   : > { %v185_v12 = vmul.f32 %v178_v8, %v171_v6  ;;  %v186_v13 = vmul.f32 %v182_v10, %v172_v7 }
  0x13   : > { %v199_v14 = vadd.f32 %v192_v9, %v185_v12  ;;  %v200_v15 = vadd.f32 %v196_v11, %v186_v13 }
  0x15   : > { %201 = vst [vmem:[%s170_s24] sm:$0xff] %v199_v14  ;;  %202 = vst [vmem:[%s170_s24 + $0x8] sm:$0xff] %v200_v15 }
  0x16 PF: > { %s13_s12 = sadd.s32 1, %s285_s12  }
  0x17   : > { %p10_p4 = scmp.ge.s32.totalorder %s13_s12, 6  }
  0x19   :  { %12 = sbr.rel (!%p10_p4) target bundleno = 1 (0x1), region = 62 }

</bundles_post_ra>
